<compile_context>
chip_gen: v7x
topology: tpu7x:2x2x1
jax: 0.10.0
libtpu: 0.0.40
codegen_flags: <defaults>
</compile_context>

<pallas_src>
import functools
import math

import jax
import jax.numpy as jnp
from jax import lax
from jax.experimental import pallas as pl
from jax.experimental.pallas import tpu as pltpu

_VMEM_LIMIT = 32 * 1024 * 1024  # fits every generation incl. v7x (64 MiB physical)


def _pick_tile(n, candidates):
    for c in candidates:
        if n % c == 0:
            return c
    raise ValueError(f"dimension {n} not divisible by any of {candidates}")


# ----------------------------------------------------------------------------
# Tiled matmul + bias kernel (qkv and proj linear layers)
# ----------------------------------------------------------------------------
def _matmul_bias_kernel(x_ref, w_ref, b_ref, o_ref, acc_ref):
    @pl.when(pl.program_id(2) == 0)
    def _init():
        acc_ref[...] = jnp.zeros_like(acc_ref)

    acc_ref[...] += jnp.dot(x_ref[...], w_ref[...],
                            preferred_element_type=jnp.float32)

    @pl.when(pl.program_id(2) == pl.num_programs(2) - 1)
    def _finalize():
        o_ref[...] = (acc_ref[...] + b_ref[...].astype(jnp.float32)
                      ).astype(o_ref.dtype)


def matmul_bias(x, w, b, *, out_dtype=None):
    # x: (M, K), w: (K, N), b: (1, N) -> (M, N); f32 accumulation regardless of dtype.
    M, K = x.shape
    K2, N = w.shape
    assert K == K2
    out_dtype = out_dtype or x.dtype
    tm = _pick_tile(M, (256, 128))
    tn = _pick_tile(N, (256, 128))
    tk = _pick_tile(K, (512, 256, 128))
    bytes_accessed = (x.size * x.dtype.itemsize + w.size * w.dtype.itemsize
                      + b.size * b.dtype.itemsize
                      + M * N * jnp.dtype(out_dtype).itemsize)
    return pl.pallas_call(
        _matmul_bias_kernel,
        out_shape=jax.ShapeDtypeStruct((M, N), out_dtype),
        grid=(M // tm, N // tn, K // tk),
        in_specs=[
            pl.BlockSpec((tm, tk), lambda i, j, k: (i, k)),
            pl.BlockSpec((tk, tn), lambda i, j, k: (k, j)),
            pl.BlockSpec((1, tn), lambda i, j, k: (0, j)),
        ],
        out_specs=pl.BlockSpec((tm, tn), lambda i, j, k: (i, j)),
        scratch_shapes=[pltpu.VMEM((tm, tn), jnp.float32)],
        compiler_params=pltpu.CompilerParams(
            dimension_semantics=("parallel", "parallel", "arbitrary"),
            vmem_limit_bytes=_VMEM_LIMIT),
        cost_estimate=pl.CostEstimate(
            flops=2 * M * N * K, transcendentals=0,
            bytes_accessed=int(bytes_accessed)),
    )(x, w, b)


# ----------------------------------------------------------------------------
# Prologue: RoPE (+ softmax scale on Q) over the Q/K head columns of the qkv slab
# ----------------------------------------------------------------------------
def _rope_qk_kernel(x_ref, cos_ref, sin_ref, o_ref, *, num_heads, scale):
    # x_ref: (ts, Dh) one head-column tile (q heads for j < H, k heads otherwise)
    x = x_ref[...].astype(jnp.float32)
    dh = x.shape[-1]
    x1 = x[:, : dh // 2]
    x2 = x[:, dh // 2:]
    rot = jnp.concatenate([-x2, x1], axis=1)          # rotate_half
    r = x * cos_ref[...] + rot * sin_ref[...]
    is_q = pl.program_id(1) < num_heads
    r = r * jnp.where(is_q, jnp.float32(scale), jnp.float32(1.0))
    o_ref[...] = r.astype(o_ref.dtype)


def rope_scale_qk(qkv, cos, sin, *, num_heads, head_dim, scale, out_dtype):
    # qkv: (S, 3*D) -> (S, 2*D) slab of [rotated+scaled q heads | rotated k heads]
    S = qkv.shape[0]
    D2 = 2 * num_heads * head_dim
    ts = _pick_tile(S, (512, 256, 128))
    return pl.pallas_call(
        functools.partial(_rope_qk_kernel, num_heads=num_heads, scale=scale),
        out_shape=jax.ShapeDtypeStruct((S, D2), out_dtype),
        grid=(S // ts, 2 * num_heads),
        in_specs=[
            pl.BlockSpec((ts, head_dim), lambda i, j: (i, j)),   # q/k head column
            pl.BlockSpec((ts, head_dim), lambda i, j: (i, 0)),   # cos
            pl.BlockSpec((ts, head_dim), lambda i, j: (i, 0)),   # sin
        ],
        out_specs=pl.BlockSpec((ts, head_dim), lambda i, j: (i, j)),
        compiler_params=pltpu.CompilerParams(
            dimension_semantics=("parallel", "parallel"),
            vmem_limit_bytes=_VMEM_LIMIT),
        cost_estimate=pl.CostEstimate(
            flops=6 * S * D2, transcendentals=0,
            bytes_accessed=int(2 * S * D2 * jnp.dtype(out_dtype).itemsize
                               + 2 * S * head_dim * 4)),
    )(qkv, cos, sin)


# ----------------------------------------------------------------------------
# Flash (online-softmax) varlen attention kernel
# ----------------------------------------------------------------------------
def _flash_varlen_attn_kernel(
        # scalar prefetch (SMEM)
        kv_start_ref, kv_end_ref, q_lo_ref, q_hi_ref, k_lo_ref, k_hi_ref,
        # VMEM input tiles
        q_ref, k_ref, v_ref, segq_ref, segk_ref,
        # output tile
        o_ref,
        # scratch
        m_sc, l_sc, acc_sc):
    qi = pl.program_id(1)
    ki = pl.program_id(2)

    @pl.when(ki == 0)
    def _init():
        m_sc[...] = jnp.full_like(m_sc, -jnp.inf)
        l_sc[...] = jnp.zeros_like(l_sc)
        acc_sc[...] = jnp.zeros_like(acc_sc)

    # KV tiles outside [kv_start, kv_end] cannot overlap this Q tile's segments:
    # their DMAs were already elided by the clamped index_maps; skip compute too.
    overlap = jnp.logical_and(ki >= kv_start_ref[qi], ki <= kv_end_ref[qi])
    # Whole tile pair inside a single segment -> no per-element mask needed.
    single_segment = jnp.logical_and(
        jnp.logical_and(q_lo_ref[qi] == q_hi_ref[qi],
                        k_lo_ref[ki] == k_hi_ref[ki]),
        q_lo_ref[qi] == k_lo_ref[ki])

    def _update(apply_mask):
        # q is already RoPE'd and pre-scaled; k is RoPE'd. MXU in input dtype (bf16).
        s = lax.dot_general(q_ref[...], k_ref[...],
                            (((1,), (1,)), ((), ())),
                            preferred_element_type=jnp.float32)   # (TQ, TKV)
        if apply_mask:
            mask = segq_ref[...] == segk_ref[...]                 # (TQ,1)==(1,TKV)
            s = jnp.where(mask, s, -1e30)
        m_prev = m_sc[...]
        m_new = jnp.maximum(m_prev, jnp.max(s, axis=-1, keepdims=True))
        alpha = jnp.exp(m_prev - m_new)
        p = jnp.exp(s - m_new)
        l_sc[...] = alpha * l_sc[...] + jnp.sum(p, axis=-1, keepdims=True)
        acc_sc[...] = alpha * acc_sc[...] + jnp.dot(
            p.astype(v_ref.dtype), v_ref[...],
            preferred_element_type=jnp.float32)
        m_sc[...] = m_new

    @pl.when(jnp.logical_and(overlap, single_segment))
    def _compute_unmasked():
        _update(apply_mask=False)

    @pl.when(jnp.logical_and(overlap, jnp.logical_not(single_segment)))
    def _compute_masked():
        _update(apply_mask=True)

    @pl.when(ki == pl.num_programs(2) - 1)
    def _finalize():
        l = l_sc[...]
        l = jnp.where(l > 0.0, l, 1.0)   # padded rows: avoid inf; output discarded
        o_ref[...] = (acc_sc[...] / l).astype(o_ref.dtype)


# ----------------------------------------------------------------------------
# Module forward
# ----------------------------------------------------------------------------
def vision_flash_attention2(hidden_states, cu_seqlens, rotary_pos_emb, params,
                            num_heads, *, tq=256, tkv=256,
                            compute_dtype=jnp.bfloat16):
    S, D = hidden_states.shape
    H = num_heads
    Dh = D // H
    assert tq % 128 == 0 and tkv % 128 == 0
    assert D % 128 == 0 and Dh % 128 == 0, "pad head_dim to a multiple of 128 upstream"

    out_dtype = hidden_states.dtype

    # Pad the token axis so all grids divide evenly; padded rows get a segment id
    # one past the last real segment so they never attend across real tokens.
    tile = math.lcm(tq, tkv)
    S_pad = pl.cdiv(S, tile) * tile
    pad = S_pad - S
    x = jnp.pad(hidden_states, ((0, pad), (0, 0))).astype(compute_dtype)
    freqs = jnp.pad(rotary_pos_emb, ((0, pad), (0, 0))).astype(jnp.float32)

    w_qkv = params["w_qkv"].astype(compute_dtype)
    b_qkv = params["b_qkv"].astype(jnp.float32)
    w_proj = params["w_proj"].astype(compute_dtype)
    b_proj = params["b_proj"].astype(jnp.float32)

    # qkv projection -> (S_pad, 3*D); columns are [q heads | k heads | v heads],
    # each head a contiguous Dh chunk (matches torch reshape(seq, 3, H, Dh)).
    qkv = matmul_bias(x, w_qkv, b_qkv, out_dtype=compute_dtype)

    # RoPE tables (f32); RoPE + softmax scale applied ONCE per token (prologue pass)
    cos = jnp.concatenate([jnp.cos(freqs)] * 2, axis=-1)    # (S_pad, Dh)
    sin = jnp.concatenate([jnp.sin(freqs)] * 2, axis=-1)    # (S_pad, Dh)
    scale = 1.0 / math.sqrt(Dh)
    qk_rot = rope_scale_qk(qkv, cos, sin, num_heads=H, head_dim=Dh, scale=scale,
                           out_dtype=compute_dtype)          # (S_pad, 2*D)

    # Segment ids and per-tile segment ranges.
    positions = jnp.arange(S_pad, dtype=jnp.int32)
    seg = (jnp.searchsorted(cu_seqlens.astype(jnp.int32), positions,
                            side="right") - 1).astype(jnp.int32)
    seg_col = seg[:, None]                                   # (S_pad, 1)
    seg_row = seg[None, :]                                   # (1, S_pad)

    n_q = S_pad // tq
    n_kv = S_pad // tkv
    q_lo = seg[0::tq]
    q_hi = seg[tq - 1::tq]
    k_lo = seg[0::tkv]
    k_hi = seg[tkv - 1::tkv]
    # Segments are contiguous, so overlapping KV tiles for each Q tile form a
    # contiguous block-index range [kv_start, kv_end].
    kv_start = jnp.searchsorted(k_hi, q_lo, side="left").astype(jnp.int32)
    kv_end = (jnp.searchsorted(k_lo, q_hi, side="right") - 1).astype(jnp.int32)

    def _clamp(ki, qi, kvs, kve):
        return jnp.minimum(jnp.maximum(ki, kvs[qi]), kve[qi])

    def q_idx(h, qi, ki, kvs, kve, *_):
        return (qi, h)

    def k_idx(h, qi, ki, kvs, kve, *_):
        return (_clamp(ki, qi, kvs, kve), H + h)

    def v_idx(h, qi, ki, kvs, kve, *_):
        return (_clamp(ki, qi, kvs, kve), 2 * H + h)

    def segq_idx(h, qi, ki, *_):
        return (qi, 0)

    def segk_idx(h, qi, ki, kvs, kve, *_):
        return (0, _clamp(ki, qi, kvs, kve))

    itemsize = jnp.dtype(compute_dtype).itemsize
    attn = pl.pallas_call(
        _flash_varlen_attn_kernel,
        out_shape=jax.ShapeDtypeStruct((S_pad, D), compute_dtype),
        grid_spec=pltpu.PrefetchScalarGridSpec(
            num_scalar_prefetch=6,
            grid=(H, n_q, n_kv),
            in_specs=[
                # q / k from the rotated slab, v from the qkv slab
                pl.BlockSpec((tq, Dh), q_idx),
                pl.BlockSpec((tkv, Dh), k_idx),
                pl.BlockSpec((tkv, Dh), v_idx),
                # segment ids for the block-diagonal mask
                pl.BlockSpec((tq, 1), segq_idx),
                pl.BlockSpec((1, tkv), segk_idx),
            ],
            # head-major (S_pad, D) output slab: lane-dense 128-wide stores;
            # matches torch's reshape(seq, -1) for free.
            out_specs=pl.BlockSpec((tq, Dh), q_idx),
            scratch_shapes=[
                pltpu.VMEM((tq, 1), jnp.float32),    # running max m
                pltpu.VMEM((tq, 1), jnp.float32),    # running denom l
                pltpu.VMEM((tq, Dh), jnp.float32),   # running accumulator
            ]),
        compiler_params=pltpu.CompilerParams(
            dimension_semantics=("parallel", "parallel", "arbitrary"),
            vmem_limit_bytes=_VMEM_LIMIT),
        cost_estimate=pl.CostEstimate(
            flops=int(4 * H * S_pad * S_pad * Dh),
            transcendentals=int(H * S_pad * S_pad),
            bytes_accessed=int(H * S_pad * (3 * Dh + Dh) * itemsize
                               + 2 * S_pad * 4)),
    )(kv_start, kv_end, q_lo, q_hi, k_lo, k_hi,
      qk_rot, qk_rot, qkv, seg_col, seg_row)

    # output projection (back to the input dtype), then drop padded rows
    out = matmul_bias(attn, w_proj, b_proj, out_dtype=out_dtype)
    return out[:S]


# ----------------------------------------------------------------------------
# Pure-JAX reference for a numerical sanity check
# ----------------------------------------------------------------------------
def reference_forward(hidden_states, cu_seqlens, freqs, params, H):
    S, D = hidden_states.shape
    Dh = D // H
    qkv = hidden_states @ params["w_qkv"] + params["b_qkv"]
    qkv = qkv.reshape(S, 3, H, Dh)
    q, k, v = qkv[:, 0], qkv[:, 1], qkv[:, 2]  # (S, H, Dh)

    cos = jnp.concatenate([jnp.cos(freqs)] * 2, -1)[:, None, :]
    sin = jnp.concatenate([jnp.sin(freqs)] * 2, -1)[:, None, :]

    def rope(x):
        x1, x2 = x[..., :Dh // 2], x[..., Dh // 2:]
        return x * cos + jnp.concatenate([-x2, x1], -1) * sin

    q = rope(q)
    k = rope(k)

    pos = jnp.arange(S)
    seg = jnp.searchsorted(cu_seqlens, pos, side="right") - 1
    mask = seg[:, None] == seg[None, :]

    s = jnp.einsum("qhd,khd->hqk", q, k) / math.sqrt(Dh)
    s = jnp.where(mask[None], s, -jnp.inf)
    p = jax.nn.softmax(s, axis=-1)
    o = jnp.einsum("hqk,khd->qhd", p, v).reshape(S, D)
    return o @ params["w_proj"] + params["b_proj"]


if __name__ == "__main__":
    seq_length = 520          # not a multiple of 256 -> exercises padding path
    dim = 256
    num_heads = 2
    head_dim = dim // num_heads  # 128

    key = jax.random.PRNGKey(0)
    k1, k2, k3, k4, k5, k6 = jax.random.split(key, 6)

    hidden_states = jax.random.normal(k1, (seq_length, dim), dtype=jnp.float32)
    rotary_pos_emb = jax.random.uniform(
        k2, (seq_length, head_dim // 2), dtype=jnp.float32, maxval=2.0 * math.pi)
    cu_seqlens = jnp.array([0, 64, 300, 520], dtype=jnp.int32)  # 3 varlen seqs

    params = {
        "w_qkv": 0.05 * jax.random.normal(k3, (dim, 3 * dim), dtype=jnp.float32),
        "b_qkv": 0.05 * jax.random.normal(k4, (1, 3 * dim), dtype=jnp.float32),
        "w_proj": 0.05 * jax.random.normal(k5, (dim, dim), dtype=jnp.float32),
        "b_proj": 0.05 * jax.random.normal(k6, (1, dim), dtype=jnp.float32),
    }

    ref = reference_forward(hidden_states, cu_seqlens, rotary_pos_emb, params,
                            num_heads)

    # Production config: bf16 MXU operands, f32 softmax bookkeeping / accumulators.
    out_bf16 = vision_flash_attention2(
        hidden_states, cu_seqlens, rotary_pos_emb, params, num_heads,
        compute_dtype=jnp.bfloat16)
    out_bf16 = jax.block_until_ready(out_bf16)
    assert out_bf16.shape == (seq_length, dim)
    assert jnp.allclose(out_bf16, ref, atol=5e-2, rtol=5e-2), "bf16 mismatch vs reference"

    # f32 compute path for a tighter numerical check of the kernel logic.
    out_f32 = vision_flash_attention2(
        hidden_states, cu_seqlens, rotary_pos_emb, params, num_heads,
        compute_dtype=jnp.float32)
    out_f32 = jax.block_until_ready(out_f32)
    assert jnp.allclose(out_f32, ref, atol=1e-2, rtol=1e-2), "f32 mismatch vs reference"

    print("KERNEL_OK")
</pallas_src>

<mosaic_0001>
module attributes {stable_mosaic.version = 11 : i64} {
  func.func @_matmul_bias_kernel(%arg0: i32, %arg1: i32, %arg2: i32, %arg3: memref<256x256xbf16, #tpu.memory_space<vmem>>, %arg4: memref<256x256xbf16, #tpu.memory_space<vmem>>, %arg5: memref<1x256xf32, #tpu.memory_space<vmem>>, %arg6: memref<256x256xbf16, #tpu.memory_space<vmem>>, %arg7: memref<256x256xf32, #tpu.memory_space<vmem>>) attributes {dimension_semantics = [#tpu.dimension_semantics<parallel>, #tpu.dimension_semantics<parallel>, #tpu.dimension_semantics<arbitrary>], iteration_bounds = array<i64: 3, 3, 1>, scalar_prefetch = 0 : i64, scratch_operands = 1 : i64, tpu.core_type = #tpu.core_type<tc>, window_params = [{transform_indices = @transform_0, window_bounds = array<i64: 256, 256>}, {transform_indices = @transform_1, window_bounds = array<i64: 256, 256>}, {transform_indices = @transform_2, window_bounds = array<i64: 1, 256>}, {transform_indices = @transform_3, window_bounds = array<i64: 256, 256>}]} {
    %c0_i32 = arith.constant 0 : i32
    %0 = arith.cmpi eq, %arg2, %c0_i32 : i32
    %1 = arith.extui %0 : i1 to i32
    %c0_i32_0 = arith.constant 0 : i32
    %2 = arith.cmpi ne, %1, %c0_i32_0 : i32
    scf.if %2 {
      %cst_10 = arith.constant 0.000000e+00 : f32
      %12 = vector.broadcast %cst_10 : f32 to vector<256x256xf32>
      %c0_11 = arith.constant 0 : index
      %c0_12 = arith.constant 0 : index
      %13 = vector.load %arg7[%c0_11, %c0_12] : memref<256x256xf32, #tpu.memory_space<vmem>>, vector<256x256xf32>
      tpu.vector_store %arg7[%c0_11, %c0_12], %12 {strides = array<i32>} : memref<256x256xf32, #tpu.memory_space<vmem>>, vector<256x256xf32>,
    } else {
    }
    %c0 = arith.constant 0 : index
    %c0_1 = arith.constant 0 : index
    %3 = vector.load %arg7[%c0, %c0_1] : memref<256x256xf32, #tpu.memory_space<vmem>>, vector<256x256xf32>
    %c0_2 = arith.constant 0 : index
    %c0_3 = arith.constant 0 : index
    %4 = vector.load %arg3[%c0_2, %c0_3] : memref<256x256xbf16, #tpu.memory_space<vmem>>, vector<256x256xbf16>
    %c0_4 = arith.constant 0 : index
    %c0_5 = arith.constant 0 : index
    %5 = vector.load %arg4[%c0_4, %c0_5] : memref<256x256xbf16, #tpu.memory_space<vmem>>, vector<256x256xbf16>
    %cst = arith.constant dense<0.000000e+00> : vector<256x256xf32>
    %6 = tpu.matmul %4, %5, %cst {dimension_numbers = #tpu.dot_dimension_numbers<[1], [0], [0], [1], [0, 0, 1, 1], [], []>} : vector<256x256xbf16>, vector<256x256xbf16>, vector<256x256xf32> -> vector<256x256xf32>
    %7 = arith.addf %3, %6 : vector<256x256xf32>
    %c0_6 = arith.constant 0 : index
    %c0_7 = arith.constant 0 : index
    %8 = vector.load %arg7[%c0_6, %c0_7] : memref<256x256xf32, #tpu.memory_space<vmem>>, vector<256x256xf32>
    tpu.vector_store %arg7[%c0_6, %c0_7], %7 {strides = array<i32>} : memref<256x256xf32, #tpu.memory_space<vmem>>, vector<256x256xf32>,
    %c0_i32_8 = arith.constant 0 : i32
    %9 = arith.cmpi eq, %arg2, %c0_i32_8 : i32
    %10 = arith.extui %9 : i1 to i32
    %c0_i32_9 = arith.constant 0 : i32
    %11 = arith.cmpi ne, %10, %c0_i32_9 : i32
    scf.if %11 {
      %c0_10 = arith.constant 0 : index
      %c0_11 = arith.constant 0 : index
      %12 = vector.load %arg7[%c0_10, %c0_11] : memref<256x256xf32, #tpu.memory_space<vmem>>, vector<256x256xf32>
      %c0_12 = arith.constant 0 : index
      %c0_13 = arith.constant 0 : index
      %13 = vector.load %arg5[%c0_12, %c0_13] : memref<1x256xf32, #tpu.memory_space<vmem>>, vector<1x256xf32>
      %14 = vector.broadcast %13 : vector<1x256xf32> to vector<256x256xf32>
      %15 = arith.addf %12, %14 : vector<256x256xf32>
      %16 = arith.truncf %15 : vector<256x256xf32> to vector<256x256xbf16>
      %c0_14 = arith.constant 0 : index
      %c0_15 = arith.constant 0 : index
      %17 = vector.load %arg6[%c0_14, %c0_15] : memref<256x256xbf16, #tpu.memory_space<vmem>>, vector<256x256xbf16>
      tpu.vector_store %arg6[%c0_14, %c0_15], %16 {strides = array<i32>} : memref<256x256xbf16, #tpu.memory_space<vmem>>, vector<256x256xbf16>,
    } else {
    }
    return
  }
  func.func @transform_0(%arg0: i32, %arg1: i32, %arg2: i32) -> (i32, i32) {
    %c0_i32 = arith.constant 0 : i32
    return %arg0, %arg2 : i32, i32
  }
  func.func @transform_1(%arg0: i32, %arg1: i32, %arg2: i32) -> (i32, i32) {
    %c0_i32 = arith.constant 0 : i32
    return %arg2, %arg1 : i32, i32
  }
  func.func @transform_2(%arg0: i32, %arg1: i32, %arg2: i32) -> (i32, i32) {
    %c0_i32 = arith.constant 0 : i32
    %c0_i32_0 = arith.constant 0 : i32
    return %c0_i32, %arg1 : i32, i32
  }
  func.func @transform_3(%arg0: i32, %arg1: i32, %arg2: i32) -> (i32, i32) {
    %c0_i32 = arith.constant 0 : i32
    return %arg0, %arg1 : i32, i32
  }
}

</mosaic_0001>

<bundles_post_ra>
// kernel: tpu_custom_call.1
= control target key start
LH: loop header
LB: loop body
LE: loop exit
PB: predicated region body
PF: predicated region fallthrough
CT: control target
= control target key end

     0   :  { %s2930_s0 = inlined_call_operand.hbm [shape: bf16[768,256], index: 0, kind: input, shape index: {}]   ;;  %s2931_s1 = inlined_call_operand.hbm [shape: bf16[256,768], index: 1, kind: input, shape index: {}]   ;;  %s2932_s2 = inlined_call_operand.hbm [shape: f32[1,768], index: 2, kind: input, shape index: {}]   ;;  %s2933_s3 = inlined_call_operand.hbm [shape: bf16[768,768], index: 3, kind: output, shape index: {}]  }
   0x1   :  { %2951 = sst [smem:[#allocation25_spill]] %s2931_s1 }
   0x2   :  { %2952 = sst [smem:[#allocation26_spill]] %s2933_s3 }
   0x3   :  { %8 = vsyncpa [#allocation4], 0 }
   0x4   :  { %10 = vsyncpa [#allocation4 + $0x1], 0 }
   0x5   :  { %11 = vsyncpa [#allocation7], 0 }
   0x6   :  { %13 = vsyncpa [#allocation7 + $0x1], 0 }
   0x7   :  { %14 = vsyncpa [#allocation5], 0 }
   0x8   :  { %16 = vsyncpa [#allocation5 + $0x1], 0  ;;  %s2363_s12 = smov 0   ;;  %s2365_s13 = smov 0  }
   0x9   :  { %s2367_s14 = smov 0   ;;  %s2369_s15 = smov 0  }
   0xa   :  { %s2371_s16 = smov 0   ;;  %s2373_s17 = smov 0  }
   0xb   :  { %s2375_s18 = smov 0   ;;  %s2377_s19 = smov 0  }
   0xc   :  { %s2379_s20 = smov 0   ;;  %s2381_s21 = smov 0  }
   0xd   :  { %s2383_s22 = smov 0   ;;  %s2385_s23 = smov 0  }
   0xe   :  { %s2387_s24 = smov 0   ;;  %s2389_s25 = smov 0  }
   0xf LB: > { %2953 = sst [smem:[#allocation13_spill]] %s2287_s14  ;;  %s37_s26 = sadd.s32 1, %s2323_s23  ;;  %s2331_s25 = sphi %s2389_s25, %s22_s25   ;;  %s2327_s24 = sphi %s2387_s24, %s3004_s24   ;;  %s2323_s23 = sphi %s2385_s23, %s3012_s23   ;;  %s2319_s22 = sphi %s2383_s22, %s3002_s22   ;;  %s2315_s21 = sphi %s2381_s21, %s3011_s21   ;;  %s2311_s20 = sphi %s2379_s20, %s3000_s20   ;;  %s2307_s19 = sphi %s2377_s19, %s3010_s19   ;;  %s2303_s18 = sphi %s2375_s18, %s3009_s18   ;;  %s2299_s17 = sphi %s2373_s17, %s2998_s17   ;;  %s2295_s16 = sphi %s2371_s16, %s3008_s16   ;;  %s2291_s15 = sphi %s2369_s15, %s3007_s15   ;;  %s2287_s14 = sphi %s2367_s14, %s2996_s14   ;;  %s2283_s13 = sphi %s2365_s13, %s3006_s13   ;;  %s2279_s12 = sphi %s2363_s12, %s3005_s12  }
  0x10   : > { %2954 = sst [smem:[#allocation14_spill]] %s2299_s17  ;;  %p2936_p0 = scmp.eq.s32.totalorder %s2331_s25, 0 }
  0x11   : > { %2955 = sst [smem:[#allocation15_spill]] %s2311_s20  ;;  %p2437_p1 = scmp.ge.s32.totalorder %s37_s26, 3 }
  0x12   : > { %2956 = sst [smem:[#allocation16_spill]] %s2315_s21  ;;  %p85_p2 = scmp.ne.s32.totalorder %s2299_s17, %s2295_s16 }
  0x13   : > { %2957 = sst [smem:[#allocation17_spill]] %s2319_s22  ;;  %p2935_p4 = scmp.lt.s32.totalorder %s2331_s25, 9 }
  0x14   : > { %2958 = sst [smem:[#allocation18_spill]] %s2323_s23  ;;  %p87_p5 = por %p85_p2, %p2936_p0 }
  0x15   : > { %2959 = sst [smem:[#allocation19_spill]] %s2327_s24  ;;  %s193_s29 = sand.u32 1, %s2331_s25  }
  0x16   : > { %s2934_s30 = sand.u32 1, %s2299_s17   ;;  %s1786_s5 = sshll.u32 %s2323_s23, 7 }
  0x17   : > { %s1670_s4 = sshll.u32 %s2934_s30, 8  ;;  %s2961_s1 = sld [smem:[#allocation25_spill]] }
  0x18   : > { %s197_s9 = scalar_lea.vmem [#allocation6], %s1670_s4  ;;  %p2461_p6 = pnand %p2935_p4, %p87_p5 }
  0x19   : > { %s207_s10 = sshll.u32 %s197_s9, 4  ;;  %s2468_s30 = scalar_lea.sflag [#allocation7], %s193_s29  ;;  %s2465_s10 = int_to_ptr.vmem [resolvable:$true] %s207_s10 }
  0x1a   : > { %p2947_p9 = pneg %p2461_p6 }
  0x1d   : > { %s2457_s8 = scalar_lea.hbm %s2961_s1, %s1786_s5  ;;  %s2096_s7 = scalar_lea.hbm %s2961_s1, 12288 }
  0x1e   : > { %s2091_s5 = scalar_lea.hbm %s2457_s8, 4096  ;;  %p2097_p12 = scmp.lt.u32.totalorder %s2457_s8, %s2961_s1 }
  0x1f   : > { %p2092_p8 = scmp.ne.s32.totalorder %s2457_s8, %s2091_s5  ;;  %p2098_p13 = scmp.lt.u32.totalorder %s2096_s7, %s2091_s5 }
  0x20   : > { %p2100_p5 = scmp.lt.u32.totalorder %s2091_s5, %s2457_s8 }
  0x21   : > { %p2094_p10 = pnand %p2947_p9, %p2092_p8  ;;  %p2099_p2 = por %p2098_p13, %p2097_p12 }
  0x23   : > { %p2095_p11 = pneg %p2094_p10  ;;  %p2101_p4 = por %p2100_p5, %p2099_p2 }
  0x25   : > { %p2102_p3 = pnand %p2101_p4, %p2095_p11 }
  0x27   : > { %2105 = shalt.err (!%p2102_p3)
}
  0x28   : > { %s2106_s29 = scalar_lea.vmem %s2465_s10, 4096  ;;  %s2333_s4 = smov [#allocation6]  }
  0x29   : > { %p2107_p8 = scmp.ne.s32.totalorder %s2465_s10, %s2106_s29  ;;  %s2111_s6 = sshll.u32 %s2333_s4, 4  ;;  %s2112_s6 = int_to_ptr.vmem [resolvable:$false] %s2111_s6 }
  0x2a   : > { %s2113_s28 = scalar_lea.vmem %s2112_s6, 8192  ;;  %p2114_p7 = scmp.lt.s32.totalorder %s2465_s10, %s2112_s6 }
  0x2b   : > { %p2109_p10 = pnand %p2107_p8, %p2947_p9  ;;  %p2115_p12 = scmp.lt.s32.totalorder %s2113_s28, %s2106_s29 }
  0x2d   : > { %p2110_p0 = pneg %p2109_p10  ;;  %p2116_p13 = por %p2115_p12, %p2114_p7 }
  0x2f   : > { %p2117_p2 = pnand %p2116_p13, %p2110_p0 }
  0x31   : > { %2120 = shalt.err (!%p2117_p2)
}
  0x32   : > { %s2334_s5 = smov 384   ;;  %s2937_s7 = smov 128  }
  0x33   : > { %s2938_s9 = smov 8   ;;  %p234_p0 = scmp.lt.s32.totalorder %s2331_s25, 10 }
  0x34   : > { %1867 = dma.hbm_to_vmem [thread:$0]  (!%p2461_p6), %s2457_s8, 4096, %s2465_s10, %s2468_s30, %s2334_s5, %s2937_s7, %s2938_s9  }
  0x35   : > { %p2963_p3 = scmp.ge.s32.totalorder %s2331_s25, 1  ;;  %s2506_s4 = sadd.s32 4294967295, %s2331_s25  }
  0x36   : > { %s1663_s6 = sadd.s32 4294967294, %s2331_s25   ;;  %s3014_s26 = smov (%p2437_p1, %s37_s26), 0 }
  0x37   : > { %p2501_p4 = pnand %p2963_p3, %p234_p0  ;;  %2965 = sst [smem:[#allocation20_spill]] %s3014_s26 }
  0x38   : > { %s41_s28 = sadd.s32 1, %s2327_s24  ;;  %s50_s8 = sadd.s32 1, %s2311_s20 }
  0x39   : > { %s2964_s29 = scalar_select %p2501_p4, 1, 0 }
  0x3a   : > { %s3016_s28 = smov (!%p2437_p1, %s41_s28), %s2327_s24  ;;  %p57_p7 = scmp.ne.s32.totalorder %s2311_s20, %s2307_s19 }
  0x3b   : > { %p63_p11 = scmp.ne.s32.totalorder %s2307_s19, %s2303_s18  ;;  %p43_p5 = scmp.ge.s32.totalorder %s3016_s28, 3 }
  0x3c   : > { %p64_p8 = scmp.eq.s32.totalorder %s2506_s4, 0  ;;  %p2966_p10 = scmp.eq.s32.totalorder %s2331_s25, 0 }
  0x3d   : > { %s74_s5 = ssub.s32 %s2323_s23, %s3014_s26  ;;  %s3018_s28 = smov (%p43_p5, %s3016_s28), 0 }
  0x3e   : > { %p2527_p12 = por %p2966_p10, %p57_p7  ;;  %2968 = sst [smem:[#allocation21_spill]] %s3018_s28 }
  0x3f   : > { %p2535_p1 = por %p64_p8, %p63_p11  ;;  %p76_p13 = scmp.eq.s32.totalorder %s74_s5, 0 }
  0x40   : > { %s45_s18 = ssub.s32 %s2327_s24, %s3018_s28  ;;  %p2970_p2 = scmp.ne.s32.totalorder %s2295_s16, %s2291_s15 }
  0x41   : > { %s2969_s27 = scalar_select %p2535_p1, 1, 0 }
  0x42   : > { %p2544_p0 = por %p2970_p2, %p64_p8  ;;  %p48_p3 = scmp.eq.s32.totalorder %s45_s18, 0 }
  0x43   : > { %s129_s9 = sor.u32 %s74_s5, %s45_s18  ;;  %s2972_s1 = sadd.s32 1, %s2299_s17 }
  0x44   : > { %s2971_s7 = scalar_select %p2544_p0, 1, 0 }
  0x45   : > { %s2551_s26 = scalar_select %p76_p13, %s2299_s17, %s2972_s1  }
  0x46   : > { %s2554_s3 = scalar_select %p48_p3, %s2311_s20, %s50_s8  }
  0x47   : > { %2973 = sst [smem:[#allocation22_spill]] %s2551_s26  ;;  %p130_p7 = scmp.eq.s32.totalorder %s129_s9, 0 }
  0x48   : > { %2974 = sst [smem:[#allocation23_spill]] %s2554_s3  ;;  %s132_s21 = sadd.s32 1, %s2287_s14 }
  0x49   : > { %p142_p11 = scmp.ne.s32.totalorder %s2287_s14, %s2283_s13  ;;  %p143_p5 = scmp.eq.s32.totalorder %s2506_s4, 8 }
  0x4a   : > { %s2561_s15 = scalar_select %p130_p7, %s2287_s14, %s132_s21  }
  0x4b   : > { %p2563_p8 = por %p143_p5, %p142_p11  ;;  %p148_p10 = scmp.ne.s32.totalorder %s2283_s13, %s2279_s12 }
  0x4c   : > { %2975 = sst [smem:[#allocation24_spill]] %s2561_s15  ;;  %p149_p2 = scmp.eq.s32.totalorder %s1663_s6, 8 }
  0x4d   : > { %s2976_s28 = scalar_select %p2563_p8, 1, 0 }
  0x4e   : > { %s169_s1 = sand.u32 1, %s2311_s20   ;;  %p2570_p13 = por %p149_p2, %p148_p10 }
  0x4f   : > { %s1666_s5 = sshll.u32 %s169_s1, 8  ;;  %s1785_s9 = sshll.u32 %s2327_s24, 12 }
  0x50   : > { %s2977_s8 = scalar_select %p2570_p13, 1, 0 }
  0x51   : > { %s173_s18 = scalar_lea.vmem [#allocation3], %s1666_s5  ;;  %s2578_s21 = scalar_lea.hbm %s2930_s0, %s1785_s9 }
  0x52   : > { %s183_s3 = sshll.u32 %s173_s18, 4  ;;  %p2978_p3 = scmp.lt.s32.totalorder %s2331_s25, 9  ;;  %s2580_s3 = int_to_ptr.vmem [resolvable:$true] %s183_s3 }
  0x53   : > { %s2980_s24 = sand.u32 1, %s2299_s17   ;;  %s1787_s22 = sshll.u32 %s2323_s23, 5 }
  0x54   : > { %p2586_p7 = pnand %p2978_p3, %p2527_p12  ;;  %s2592_s5 = sshll.u32 %s2980_s24, 1 }
  0x55   : > { %s2598_s18 = scalar_lea.hbm %s2932_s2, %s1787_s22  ;;  %s2600_s20 = scalar_lea.sflag [#allocation4], %s169_s1 }
  0x56   : > { %s2121_s15 = scalar_lea.hbm %s2578_s21, 4096  ;;  %p2123_p12 = pneg %p2586_p7 }
  0x57   : > { %p2122_p11 = scmp.ne.s32.totalorder %s2578_s21, %s2121_s15  ;;  %s2126_s24 = scalar_lea.hbm %s2930_s0, 12288 }
  0x58   : > { %p2127_p2 = scmp.lt.u32.totalorder %s2578_s21, %s2930_s0  ;;  %p2128_p3 = scmp.lt.u32.totalorder %s2126_s24, %s2121_s15 }
  0x59   : > { %p2124_p5 = pnand %p2123_p12, %p2122_p11  ;;  %p2130_p13 = scmp.lt.u32.totalorder %s2121_s15, %s2578_s21 }
  0x5a   : > { %p2129_p9 = por %p2128_p3, %p2127_p2 }
  0x5b   : > { %p2125_p10 = pneg %p2124_p5 }
  0x5c   : > { %p2131_p8 = por %p2130_p13, %p2129_p9 }
  0x5e   : > { %p2132_p0 = pnand %p2131_p8, %p2125_p10 }
  0x60   : > { %2135 = shalt.err (!%p2132_p0)
}
  0x61   : > { %s2136_s1 = scalar_lea.vmem %s2580_s3, 4096  ;;  %s2337_s17 = smov [#allocation3]  }
  0x62   : > { %p2137_p11 = scmp.ne.s32.totalorder %s2580_s3, %s2136_s1  ;;  %s2141_s22 = sshll.u32 %s2337_s17, 4  ;;  %s2142_s22 = int_to_ptr.vmem [resolvable:$false] %s2141_s22 }
  0x63   : > { %s2143_s14 = scalar_lea.vmem %s2142_s22, 8192  ;;  %p2144_p4 = scmp.lt.s32.totalorder %s2580_s3, %s2142_s22 }
  0x64   : > { %p2139_p5 = pnand %p2137_p11, %p2123_p12  ;;  %p2145_p2 = scmp.lt.s32.totalorder %s2143_s14, %s2136_s1 }
  0x66   : > { %p2140_p1 = pneg %p2139_p5  ;;  %p2146_p3 = por %p2145_p2, %p2144_p4 }
  0x68   : > { %p2147_p9 = pnand %p2146_p3, %p2140_p1 }
  0x6a   : > { %2150 = shalt.err (!%p2147_p9)
}
  0x6b   : > { %s2981_s23 = smov 8   ;;  %s2982_s15 = smov 128  }
  0x6c   : > { %1864 = dma.hbm_to_vmem [thread:$0]  (!%p2586_p7), %s2578_s21, 4096, %s2580_s3, %s2600_s20, %s2982_s15, %s2982_s15, %s2981_s23  }
  0x6d   : > { %s221_s26 = scalar_lea.vmem [#allocation8], %s2592_s5  ;;  %s2151_s10 = scalar_lea.hbm %s2598_s18, 32 }
  0x6e   : > { %s229_s9 = sshll.u32 %s221_s26, 4  ;;  %p2152_p4 = scmp.ne.s32.totalorder %s2598_s18, %s2151_s10  ;;  %s230_s9 = int_to_ptr.vmem [resolvable:$true] %s229_s9 }
  0x6f   : > { %p2983_p1 = pneg %p2461_p6  ;;  %s2156_s1 = scalar_lea.hbm %s2932_s2, 96 }
  0x70   : > { %p2157_p13 = scmp.lt.u32.totalorder %s2598_s18, %s2932_s2  ;;  %p2158_p12 = scmp.lt.u32.totalorder %s2156_s1, %s2151_s10 }
  0x71   : > { %p2154_p0 = pnand %p2152_p4, %p2983_p1  ;;  %p2160_p7 = scmp.lt.u32.totalorder %s2151_s10, %s2598_s18 }
  0x72   : > { %p2159_p10 = por %p2158_p12, %p2157_p13 }
  0x73   : > { %p2155_p8 = pneg %p2154_p0 }
  0x74   : > { %p2161_p11 = por %p2160_p7, %p2159_p10 }
  0x76   : > { %p2162_p5 = pnand %p2161_p11, %p2155_p8 }
  0x78   : > { %2165 = shalt.err (!%p2162_p5)
}
  0x79   : > { %s2166_s3 = scalar_lea.vmem %s230_s9, 32  ;;  %p2984_p3 = pmov %p2983_p1 }
  0x7a   : > { %p2167_p2 = scmp.ne.s32.totalorder %s230_s9, %s2166_s3  ;;  %s2338_s20 = smov [#allocation8]  }
  0x7b   : > { %s2171_s21 = sshll.u32 %s2338_s20, 4  ;;  %s2172_s21 = int_to_ptr.vmem [resolvable:$false] %s2171_s21 }
  0x7c   : > { %p2169_p9 = pnand %p2167_p2, %p2984_p3  ;;  %s2173_s5 = scalar_lea.vmem %s2172_s21, 64 }
  0x7d   : > { %p2174_p1 = scmp.lt.s32.totalorder %s230_s9, %s2172_s21  ;;  %p2175_p0 = scmp.lt.s32.totalorder %s2173_s5, %s2166_s3 }
  0x7e   : > { %p2170_p4 = pneg %p2169_p9 }
  0x7f   : > { %p2176_p12 = por %p2175_p0, %p2174_p1 }
  0x81   : > { %p2177_p13 = pnand %p2176_p12, %p2170_p4 }
  0x83   : > { %2180 = shalt.err (!%p2177_p13)
}
  0x84   : > { %1870 = dma.hbm_to_vmem [thread:$0]  (!%p2461_p6), %s2598_s18, 32, %s230_s9, %s2468_s30  }
  0x85   : > { %p2985_p8 = scmp.ne.s32.totalorder %s2964_s29, 0 }
  0x86   : > { %s240_s14 = sand.u32 (!%p2985_p8), 1, %s2307_s19   ;;  %p2986_p10 = scmp.ne.s32.totalorder (!%p2985_p8), %s2969_s27, 0 }
  0x87   : > { %238 = sbr.rel (%p2985_p8) target bundleno = 504 (0x1f8), region = 32  ;;  %s1677_s23 = sshll.u32 (!%p2985_p8), %s240_s14, 8 }
  0x88   : > { %s241_s15 = scalar_lea.sflag (!%p2985_p8), [#allocation4], %s240_s14  ;;  %s2655_s26 = scalar_lea.vmem (!%p2985_p8), [#allocation3], %s1677_s23 }
  0x8e   : > { %2266 = dma.done.wait (%p2986_p10), %s241_s15, 4096  }
  0x8f   : > { %2268 = vsyncadd (%p2986_p10), %s241_s15, 4294963200  ;;  %s249_s30 = sand.u32 1, %s2506_s4   ;;  %s251_s11 = sand.u32 1, %s2295_s16  }
  0x90   : > { %s1678_s29 = sshll.u32 %s251_s11, 8  ;;  %s250_s18 = scalar_lea.sflag [#allocation7], %s249_s30 }
  0x91   : > { %s2665_s9 = scalar_lea.vmem [#allocation6], %s1678_s29  ;;  %p2987_p6 = scmp.ne.s32.totalorder %s2971_s7, 0 }
  0x93   : > { %2270 = dma.done.wait (%p2987_p6), %s250_s18, 4128  }
  0x94   : > { %2272 = vsyncadd (%p2987_p6), %s250_s18, 4294963168  ;;  %v1995_v0 = vld [vmem:[%s2665_s9 + $0x4] ss:$8 sps:$4 sm:$0xff]   ;;  %v1997_v1 = vld [vmem:[%s2665_s9] ss:$8 sps:$4 sm:$0xff]   ;;  %s1679_s7 = sshll.u32 %s251_s11, 1 }
  0x95   : > { %818 = vmatprep.subr.bf16.mxu0 %v1995_v0  ;;  %1820 = vmatprep.subr.bf16.mxu1 %v1995_v0  ;;  %v1998_v2 = vld [vmem:[%s2665_s9 + $0x14] ss:$8 sps:$4 sm:$0xff]   ;;  %v2000_v3 = vld [vmem:[%s2665_s9 + $0x10] ss:$8 sps:$4 sm:$0xff]   ;;  %v2001_v4 = vld [vmem:[%s2665_s9 + $0x24] ss:$8 sps:$4 sm:$0xff]   ;;  %v1208_v0 = vlaneseq }
  0x96   : > { %819 = vmatpush1.bf16.msra.mxu0 %v1997_v1  ;;  %1836 = vmatpush1.bf16.msra.mxu1 %v1997_v1  ;;  %v2003_v5 = vld [vmem:[%s2665_s9 + $0x20] ss:$8 sps:$4 sm:$0xff]   ;;  %v2004_v6 = vld [vmem:[%s2665_s9 + $0x34] ss:$8 sps:$4 sm:$0xff]   ;;  %v2006_v7 = vld [vmem:[%s2665_s9 + $0x30] ss:$8 sps:$4 sm:$0xff]  }
  0x97   : > { %820 = vmatprep.subr.bf16.mxu0 %v1998_v2  ;;  %1821 = vmatprep.subr.bf16.mxu1 %v1998_v2  ;;  %v2007_v8 = vld [vmem:[%s2665_s9 + $0x44] ss:$8 sps:$4 sm:$0xff]   ;;  %v2009_v9 = vld [vmem:[%s2665_s9 + $0x40] ss:$8 sps:$4 sm:$0xff]   ;;  %v2010_v10 = vld [vmem:[%s2665_s9 + $0x54] ss:$8 sps:$4 sm:$0xff]  }
  0x98   : > { %v2012_v11 = vld [vmem:[%s2665_s9 + $0x50] ss:$8 sps:$4 sm:$0xff]   ;;  %v2013_v12 = vld [vmem:[%s2665_s9 + $0x64] ss:$8 sps:$4 sm:$0xff]   ;;  %v2015_v14 = vld [vmem:[%s2665_s9 + $0x60] ss:$8 sps:$4 sm:$0xff]  }
  0x99   : > { %v2045_v13 = vld [vmem:[%s2655_s26 + $0x4] ss:$8 sps:$4 sm:$0xff]   ;;  %v2016_v16 = vld [vmem:[%s2665_s9 + $0x74] ss:$8 sps:$4 sm:$0xff]   ;;  %v2018_v17 = vld [vmem:[%s2665_s9 + $0x70] ss:$8 sps:$4 sm:$0xff]  }
  0x9a   : > { %821 = vmatpush1.bf16.msra.mxu0 %v2000_v3  ;;  %1837 = vmatpush1.bf16.msra.mxu1 %v2000_v3  ;;  %v2048_v15 = vld [vmem:[%s2655_s26 + $0x84] ss:$8 sps:$4 sm:$0xff]   ;;  %v2021_v19 = vld [vmem:[%s2665_s9 + $0x80] ss:$8 sps:$4 sm:$0xff]   ;;  %v2022_v20 = vld [vmem:[%s2665_s9 + $0x94] ss:$8 sps:$4 sm:$0xff]  }
  0x9b   : > { %822 = vmatprep.subr.bf16.mxu0 %v2001_v4  ;;  %1822 = vmatprep.subr.bf16.mxu1 %v2001_v4  ;;  %v2019_v18 = vld [vmem:[%s2665_s9 + $0x84] ss:$8 sps:$4 sm:$0xff]   ;;  %v2024_v21 = vld [vmem:[%s2665_s9 + $0x90] ss:$8 sps:$4 sm:$0xff]   ;;  %v2027_v23 = vld [vmem:[%s2665_s9 + $0xa0] ss:$8 sps:$4 sm:$0xff]  }
  0x9c   : > { %850 = vmatprep.mubr.bf16.mxu0 %v2045_v13  ;;  %930 = vmatprep.mubr.bf16.mxu1 %v2048_v15  ;;  %v2025_v22 = vld [vmem:[%s2665_s9 + $0xa4] ss:$8 sps:$4 sm:$0xff]   ;;  %v2028_v24 = vld [vmem:[%s2665_s9 + $0xb4] ss:$8 sps:$4 sm:$0xff]   ;;  %v2030_v25 = vld [vmem:[%s2665_s9 + $0xb0] ss:$8 sps:$4 sm:$0xff]  }
  0x9d   : > { %v2031_v26 = vld [vmem:[%s2665_s9 + $0xc4] ss:$8 sps:$4 sm:$0xff]   ;;  %v2033_v27 = vld [vmem:[%s2665_s9 + $0xc0] ss:$8 sps:$4 sm:$0xff]   ;;  %v2034_v28 = vld [vmem:[%s2665_s9 + $0xd4] ss:$8 sps:$4 sm:$0xff]  }
  0x9e   : > { %823 = vmatpush1.bf16.msra.mxu0 %v2003_v5  ;;  %1838 = vmatpush1.bf16.msra.mxu1 %v2003_v5  ;;  %v2036_v29 = vld [vmem:[%s2665_s9 + $0xd0] ss:$8 sps:$4 sm:$0xff]   ;;  %v2037_v30 = vld [vmem:[%s2665_s9 + $0xe4] ss:$8 sps:$4 sm:$0xff]   ;;  %v2039_v31 = vld [vmem:[%s2665_s9 + $0xe0] ss:$8 sps:$4 sm:$0xff]  }
  0x9f   : > { %824 = vmatprep.subr.bf16.mxu0 %v2004_v6  ;;  %1823 = vmatprep.subr.bf16.mxu1 %v2004_v6  ;;  %v2040_v32 = vld [vmem:[%s2665_s9 + $0xf4] ss:$8 sps:$4 sm:$0xff]   ;;  %v2042_v33 = vld [vmem:[%s2665_s9 + $0xf0] ss:$8 sps:$4 sm:$0xff]   ;;  %v2043_v34 = vld [vmem:[%s2655_s26] ss:$8 sps:$4 sm:$0xff]  }
  0xa0   : > { %v2046_v35 = vld [vmem:[%s2655_s26 + $0x80] ss:$8 sps:$4 sm:$0xff]   ;;  %v2049_v36 = vld [vmem:[%s2655_s26 + $0x14] ss:$8 sps:$4 sm:$0xff]   ;;  %v2053_v38 = vld [vmem:[%s2655_s26 + $0x10] ss:$8 sps:$4 sm:$0xff]  }
  0xa1   : > { %v2051_v37 = vld [vmem:[%s2655_s26 + $0x94] ss:$8 sps:$4 sm:$0xff]   ;;  %v2054_v39 = vld [vmem:[%s2655_s26 + $0x90] ss:$8 sps:$4 sm:$0xff]   ;;  %v2055_v40 = vld [vmem:[%s2655_s26 + $0x24] ss:$8 sps:$4 sm:$0xff]  }
  0xa2   : > { %825 = vmatpush1.bf16.msra.mxu0 %v2006_v7  ;;  %1839 = vmatpush1.bf16.msra.mxu1 %v2006_v7  ;;  %v2057_v41 = vld [vmem:[%s2655_s26 + $0xa4] ss:$8 sps:$4 sm:$0xff]   ;;  %v2059_v42 = vld [vmem:[%s2655_s26 + $0x20] ss:$8 sps:$4 sm:$0xff]   ;;  %v2061_v44 = vld [vmem:[%s2655_s26 + $0x34] ss:$8 sps:$4 sm:$0xff]  }
  0xa3   : > { %826 = vmatprep.subr.bf16.mxu0 %v2007_v8  ;;  %1824 = vmatprep.subr.bf16.mxu1 %v2007_v8  ;;  %v2060_v43 = vld [vmem:[%s2655_s26 + $0xa0] ss:$8 sps:$4 sm:$0xff]   ;;  %v2063_v45 = vld [vmem:[%s2655_s26 + $0xb4] ss:$8 sps:$4 sm:$0xff]   ;;  %v2065_v46 = vld [vmem:[%s2655_s26 + $0x30] ss:$8 sps:$4 sm:$0xff]  }
  0xa4   : > { %v2066_v47 = vld [vmem:[%s2655_s26 + $0xb0] ss:$8 sps:$4 sm:$0xff]   ;;  %v2067_v48 = vld [vmem:[%s2655_s26 + $0x44] ss:$8 sps:$4 sm:$0xff]   ;;  %v2071_v50 = vld [vmem:[%s2655_s26 + $0x40] ss:$8 sps:$4 sm:$0xff]  }
  0xa5   : > { %v2069_v49 = vld [vmem:[%s2655_s26 + $0xc4] ss:$8 sps:$4 sm:$0xff]   ;;  %v2072_v51 = vld [vmem:[%s2655_s26 + $0xc0] ss:$8 sps:$4 sm:$0xff]   ;;  %v2073_v52 = vld [vmem:[%s2655_s26 + $0x54] ss:$8 sps:$4 sm:$0xff]  }
  0xa6   : > { %827 = vmatpush1.bf16.msra.mxu0 %v2009_v9  ;;  %1840 = vmatpush1.bf16.msra.mxu1 %v2009_v9  ;;  %v2075_v53 = vld [vmem:[%s2655_s26 + $0xd4] ss:$8 sps:$4 sm:$0xff]   ;;  %v2077_v54 = vld [vmem:[%s2655_s26 + $0x50] ss:$8 sps:$4 sm:$0xff]   ;;  %v2079_v56 = vld [vmem:[%s2655_s26 + $0x64] ss:$8 sps:$4 sm:$0xff]  }
  0xa7   : > { %828 = vmatprep.subr.bf16.mxu0 %v2010_v10  ;;  %1825 = vmatprep.subr.bf16.mxu1 %v2010_v10  ;;  %v2078_v55 = vld [vmem:[%s2655_s26 + $0xd0] ss:$8 sps:$4 sm:$0xff]   ;;  %v2081_v57 = vld [vmem:[%s2655_s26 + $0xe4] ss:$8 sps:$4 sm:$0xff]   ;;  %v2083_v58 = vld [vmem:[%s2655_s26 + $0x60] ss:$8 sps:$4 sm:$0xff]  }
  0xa8   : > { %v2084_v59 = vld [vmem:[%s2655_s26 + $0xe0] ss:$8 sps:$4 sm:$0xff]   ;;  %v2085_v60 = vld [vmem:[%s2655_s26 + $0x74] ss:$8 sps:$4 sm:$0xff]   ;;  %v2089_v62 = vld [vmem:[%s2655_s26 + $0x70] ss:$8 sps:$4 sm:$0xff]  }
  0xa9   : > { %v2087_v61 = vld [vmem:[%s2655_s26 + $0xf4] ss:$8 sps:$4 sm:$0xff]   ;;  %v2090_v63 = vld [vmem:[%s2655_s26 + $0xf0] ss:$8 sps:$4 sm:$0xff]   ;;  %v1209_v1 = vshrl.u32 %v1208_v0, 7  ;;  %s262_s4 = scalar_lea.vmem [#allocation8], %s1679_s7 }
  0xaa   : > { %829 = vmatpush1.bf16.msra.mxu0 %v2012_v11  ;;  %1841 = vmatpush1.bf16.msra.mxu1 %v2012_v11  ;;  %v1206_v3 = vld [vmem:[%s262_s4] sm:$0x3]  ;;  %s292_s27 = sand.u32 1, %s2283_s13   ;;  %s2988_s24 = sld [smem:[#allocation17_spill]] }
  0xab   : > { %830 = vmatprep.subr.bf16.mxu0 %v2013_v12  ;;  %1826 = vmatprep.subr.bf16.mxu1 %v2013_v12  ;;  %v1210_v2 = vsub.s32 0, %v1209_v1  ;;  %v1214_v4 = vsub.s32 1, %v1209_v1  ;;  %s1680_s10 = sshll.u32 %s292_s27, 8  ;;  %s2989_s1 = sld [smem:[#allocation16_spill]] }
  0xac   : > { %s2752_s6 = scalar_lea.vmem [#allocation9], %s1680_s10  ;;  %s2990_s23 = sld [smem:[#allocation26_spill]] }
  0xad   : > { %v2737_v5 = vrot.slane %v1206_v3, %v1210_v2  ;;  %v2740_v6 = vrot.slane %v1206_v3, %v1214_v4  ;;  %s1523_s21 = sshll.u32 %s2752_s6, 4  ;;  %s2854_s30 = scalar_lea.sflag [#allocation5], %s292_s27  ;;  %s2846_s21 = int_to_ptr.vmem [resolvable:$true] %s1523_s21 }
  0xae   : > { %831 = vmatpush1.bf16.msra.mxu0 %v2015_v14  ;;  %1842 = vmatpush1.bf16.msra.mxu1 %v2015_v14  ;;  %s2181_s11 = scalar_lea.vmem %s2846_s21, 4096  ;;  %p2992_p11 = scmp.ne.s32.totalorder %s2976_s28, 0 }
  0xaf   : > { %832 = vmatprep.subr.bf16.mxu0 %v2016_v16  ;;  %1827 = vmatprep.subr.bf16.mxu1 %v2016_v16  ;;  %p2182_p7 = scmp.ne.s32.totalorder %s2846_s21, %s2181_s11  ;;  %s2339_s29 = smov [#allocation9]  }
  0xb0   : > { %s1852_s17 = smul.u32 192, %s2988_s24  ;;  %s2185_s18 = sshll.u32 %s2339_s29, 4  ;;  %s2186_s18 = int_to_ptr.vmem [resolvable:$false] %s2185_s18 }
  0xb1   : > { %s1779_s22 = sshll.u32 %s2989_s1, 1  ;;  %p2183_p5 = pnand %p2182_p7, %p2992_p11 }
  0xb2   : > { %833 = vmatpush1.bf16.msra.mxu0 %v2018_v17  ;;  %1843 = vmatpush1.bf16.msra.mxu1 %v2018_v17  ;;  %s1520_s3 = sadd.s32 %s1852_s17, %s1779_s22  ;;  %s2991_s26 = smov %s2990_s23 }
  0xb3   : > { %834 = vmatprep.subr.bf16.mxu0 %v2019_v18  ;;  %1828 = vmatprep.subr.bf16.mxu1 %v2019_v18  ;;  %s1781_s20 = sshll.u32 %s1520_s3, 6  ;;  %p2184_p2 = pneg %p2183_p5 }
  0xb4   : > { %s2844_s15 = scalar_lea.hbm %s2990_s23, %s1781_s20  ;;  %s2187_s9 = scalar_lea.vmem %s2186_s18, 8192 }
  0xb5   : > { %p2188_p3 = scmp.lt.s32.totalorder %s2846_s21, %s2186_s18  ;;  %p2189_p9 = scmp.lt.s32.totalorder %s2187_s9, %s2181_s11 }
  0xb6   : > { %835 = vmatpush1.bf16.msra.mxu0 %v2021_v19  ;;  %1844 = vmatpush1.bf16.msra.mxu1 %v2021_v19 }
  0xb7   : > { %836 = vmatprep.subr.bf16.mxu0 %v2022_v20  ;;  %1829 = vmatprep.subr.bf16.mxu1 %v2022_v20  ;;  %p2190_p4 = por %p2189_p9, %p2188_p3 }
  0xb9   : > { %p2191_p1 = pnand %p2190_p4, %p2184_p2 }
  0xba   : > { %837 = vmatpush1.bf16.msra.mxu0 %v2024_v21  ;;  %1845 = vmatpush1.bf16.msra.mxu1 %v2024_v21 }
  0xbb   : > { %838 = vmatprep.subr.bf16.mxu0 %v2025_v22  ;;  %1830 = vmatprep.subr.bf16.mxu1 %v2025_v22 }
  0xbe   : > { %839 = vmatpush1.bf16.msra.mxu0 %v2027_v23  ;;  %1846 = vmatpush1.bf16.msra.mxu1 %v2027_v23 }
  0xbf   : > { %840 = vmatprep.subr.bf16.mxu0 %v2028_v24  ;;  %1831 = vmatprep.subr.bf16.mxu1 %v2028_v24 }
  0xc2   : > { %841 = vmatpush1.bf16.msra.mxu0 %v2030_v25  ;;  %1847 = vmatpush1.bf16.msra.mxu1 %v2030_v25 }
  0xc3   : > { %842 = vmatprep.subr.bf16.mxu0 %v2031_v26  ;;  %1832 = vmatprep.subr.bf16.mxu1 %v2031_v26 }
  0xc6   : > { %843 = vmatpush1.bf16.msra.mxu0 %v2033_v27  ;;  %1848 = vmatpush1.bf16.msra.mxu1 %v2033_v27 }
  0xc7   : > { %844 = vmatprep.subr.bf16.mxu0 %v2034_v28  ;;  %1833 = vmatprep.subr.bf16.mxu1 %v2034_v28 }
  0xca   : > { %845 = vmatpush1.bf16.msra.mxu0 %v2036_v29  ;;  %1849 = vmatpush1.bf16.msra.mxu1 %v2036_v29 }
  0xcb   : > { %846 = vmatprep.subr.bf16.mxu0 %v2037_v30  ;;  %1834 = vmatprep.subr.bf16.mxu1 %v2037_v30 }
  0xce   : > { %847 = vmatpush1.bf16.msra.mxu0 %v2039_v31  ;;  %1850 = vmatpush1.bf16.msra.mxu1 %v2039_v31 }
  0xcf   : > { %848 = vmatprep.subr.bf16.mxu0 %v2040_v32  ;;  %1835 = vmatprep.subr.bf16.mxu1 %v2040_v32 }
  0xd2   : > { %849 = vmatpush1.bf16.msra.mxu0 %v2042_v33  ;;  %1851 = vmatpush1.bf16.msra.mxu1 %v2042_v33 }
  0xd5   : > { %851 = vmatmul.mubr.bf16.vlgmr.msra.gmra.mrb[0].mxu0 %v2043_v34  ;;  %931 = vmatmul.mubr.bf16.vlgmr.msra.gmra.mrb[0].mxu1 %v2046_v35 }
  0xd6   : > { %860 = vmatprep.mubr.bf16.mxu0 %v2049_v36  ;;  %940 = vmatprep.mubr.bf16.mxu1 %v2051_v37 }
  0xdd   : > { %861 = vmatmul.mubr.bf16.gmra.mrb[4].mxu0 %v2053_v38  ;;  %941 = vmatmul.mubr.bf16.gmra.mrb[4].mxu1 %v2054_v39 }
  0xde   : > { %870 = vmatprep.mubr.bf16.mxu0 %v2055_v40  ;;  %950 = vmatprep.mubr.bf16.mxu1 %v2057_v41 }
  0xe5   : > { %871 = vmatmul.mubr.bf16.gmra.mrb[8].mxu0 %v2059_v42  ;;  %951 = vmatmul.mubr.bf16.gmra.mrb[8].mxu1 %v2060_v43 }
  0xe6   : > { %880 = vmatprep.mubr.bf16.mxu0 %v2061_v44  ;;  %960 = vmatprep.mubr.bf16.mxu1 %v2063_v45 }
  0xed   : > { %881 = vmatmul.mubr.bf16.gmra.mrb[12].mxu0 %v2065_v46  ;;  %961 = vmatmul.mubr.bf16.gmra.mrb[12].mxu1 %v2066_v47 }
  0xee   : > { %890 = vmatprep.mubr.bf16.mxu0 %v2067_v48  ;;  %970 = vmatprep.mubr.bf16.mxu1 %v2069_v49 }
  0xf5   : > { %891 = vmatmul.mubr.bf16.gmra.mrb[16].mxu0 %v2071_v50  ;;  %971 = vmatmul.mubr.bf16.gmra.mrb[16].mxu1 %v2072_v51 }
  0xf6   : > { %900 = vmatprep.mubr.bf16.mxu0 %v2073_v52  ;;  %980 = vmatprep.mubr.bf16.mxu1 %v2075_v53 }
  0xfd   : > { %901 = vmatmul.mubr.bf16.gmra.mrb[20].mxu0 %v2077_v54  ;;  %981 = vmatmul.mubr.bf16.gmra.mrb[20].mxu1 %v2078_v55 }
  0xfe   : > { %910 = vmatprep.mubr.bf16.mxu0 %v2079_v56  ;;  %990 = vmatprep.mubr.bf16.mxu1 %v2081_v57 }
 0x105   : > { %911 = vmatmul.mubr.bf16.gmra.mrb[24].mxu0 %v2083_v58  ;;  %991 = vmatmul.mubr.bf16.gmra.mrb[24].mxu1 %v2084_v59 }
 0x106   : > { %920 = vmatprep.mubr.bf16.mxu0 %v2085_v60  ;;  %1000 = vmatprep.mubr.bf16.mxu1 %v2087_v61 }
 0x10d   : > { %921 = vmatmul.mubr.bf16.gmra.mrb[28].mxu0 %v2089_v62  ;;  %1001 = vmatmul.mubr.bf16.gmra.mrb[28].mxu1 %v2090_v63 }
 0x1a8   : > { %v852_v7 = vpop.f32.mrb[0].mxu0  ;;  %v932_v8 = vpop.f32.mrb[0].mxu1 }
 0x1a9   : > { %v1218_v9 = vadd.f32 %v2737_v5, %v852_v7  ;;  %v1250_v10 = vadd.f32 %v2737_v5, %v932_v8  ;;  %v854_v11 = vpop.f32.mrb[1].mxu0  ;;  %v934_v12 = vpop.f32.mrb[1].mxu1 }
 0x1aa   : > { %v1219_v13 = vadd.f32 %v2740_v6, %v854_v11  ;;  %v1251_v14 = vadd.f32 %v2740_v6, %v934_v12  ;;  %v856_v15 = vpop.f32.mrb[2].mxu0  ;;  %v936_v16 = vpop.f32.mrb[2].mxu1 }
 0x1ab   : > { %v1220_v17 = vadd.f32 %v2737_v5, %v856_v15  ;;  %v1252_v18 = vadd.f32 %v2737_v5, %v936_v16  ;;  %v858_v19 = vpop.f32.mrb[3].mxu0  ;;  %v938_v20 = vpop.f32.mrb[3].mxu1 }
 0x1ac   : > { %v1788_v21 = vpack.c.bf16 %v1219_v13, %v1218_v9  ;;  %v1804_v22 = vpack.c.bf16 %v1251_v14, %v1250_v10  ;;  %v1221_v23 = vadd.f32 %v2740_v6, %v858_v19  ;;  %v1253_v24 = vadd.f32 %v2740_v6, %v938_v20 }
 0x1ae   : > { %1474 = vst [vmem:[%s2752_s6] sm:$0xff] %v1788_v21  ;;  %1490 = vst [vmem:[%s2752_s6 + $0x80] sm:$0xff] %v1804_v22  ;;  %v1789_v25 = vpack.c.bf16 %v1221_v23, %v1220_v17  ;;  %v1805_v26 = vpack.c.bf16 %v1253_v24, %v1252_v18 }
 0x1b0   : > { %1475 = vst [vmem:[%s2752_s6 + $0x8] sm:$0xff] %v1789_v25  ;;  %1491 = vst [vmem:[%s2752_s6 + $0x88] sm:$0xff] %v1805_v26  ;;  %v862_v27 = vpop.f32.mrb[4].mxu0  ;;  %v942_v28 = vpop.f32.mrb[4].mxu1 }
 0x1b1   : > { %v1222_v29 = vadd.f32 %v2737_v5, %v862_v27  ;;  %v1254_v30 = vadd.f32 %v2737_v5, %v942_v28  ;;  %v864_v31 = vpop.f32.mrb[5].mxu0  ;;  %v944_v32 = vpop.f32.mrb[5].mxu1 }
 0x1b2   : > { %v1223_v33 = vadd.f32 %v2740_v6, %v864_v31  ;;  %v1255_v34 = vadd.f32 %v2740_v6, %v944_v32  ;;  %v866_v35 = vpop.f32.mrb[6].mxu0  ;;  %v946_v36 = vpop.f32.mrb[6].mxu1 }
 0x1b3   : > { %v1224_v37 = vadd.f32 %v2737_v5, %v866_v35  ;;  %v1256_v38 = vadd.f32 %v2737_v5, %v946_v36  ;;  %v868_v39 = vpop.f32.mrb[7].mxu0  ;;  %v948_v40 = vpop.f32.mrb[7].mxu1 }
 0x1b4   : > { %v1790_v41 = vpack.c.bf16 %v1223_v33, %v1222_v29  ;;  %v1806_v42 = vpack.c.bf16 %v1255_v34, %v1254_v30  ;;  %v1225_v43 = vadd.f32 %v2740_v6, %v868_v39  ;;  %v1257_v44 = vadd.f32 %v2740_v6, %v948_v40 }
 0x1b6   : > { %1476 = vst [vmem:[%s2752_s6 + $0x10] sm:$0xff] %v1790_v41  ;;  %1492 = vst [vmem:[%s2752_s6 + $0x90] sm:$0xff] %v1806_v42  ;;  %v1791_v45 = vpack.c.bf16 %v1225_v43, %v1224_v37  ;;  %v1807_v46 = vpack.c.bf16 %v1257_v44, %v1256_v38 }
 0x1b8   : > { %1477 = vst [vmem:[%s2752_s6 + $0x18] sm:$0xff] %v1791_v45  ;;  %1493 = vst [vmem:[%s2752_s6 + $0x98] sm:$0xff] %v1807_v46  ;;  %v872_v47 = vpop.f32.mrb[8].mxu0  ;;  %v952_v48 = vpop.f32.mrb[8].mxu1 }
 0x1b9   : > { %v1226_v49 = vadd.f32 %v2737_v5, %v872_v47  ;;  %v1258_v50 = vadd.f32 %v2737_v5, %v952_v48  ;;  %v874_v51 = vpop.f32.mrb[9].mxu0  ;;  %v954_v52 = vpop.f32.mrb[9].mxu1 }
 0x1ba   : > { %v1227_v53 = vadd.f32 %v2740_v6, %v874_v51  ;;  %v1259_v54 = vadd.f32 %v2740_v6, %v954_v52  ;;  %v876_v55 = vpop.f32.mrb[10].mxu0  ;;  %v956_v56 = vpop.f32.mrb[10].mxu1 }
 0x1bb   : > { %v1228_v57 = vadd.f32 %v2737_v5, %v876_v55  ;;  %v1260_v58 = vadd.f32 %v2737_v5, %v956_v56  ;;  %v878_v59 = vpop.f32.mrb[11].mxu0  ;;  %v958_v60 = vpop.f32.mrb[11].mxu1 }
 0x1bc   : > { %v1792_v61 = vpack.c.bf16 %v1227_v53, %v1226_v49  ;;  %v1808_v62 = vpack.c.bf16 %v1259_v54, %v1258_v50  ;;  %v1229_v63 = vadd.f32 %v2740_v6, %v878_v59  ;;  %v1261_v0 = vadd.f32 %v2740_v6, %v958_v60 }
 0x1be   : > { %1478 = vst [vmem:[%s2752_s6 + $0x20] sm:$0xff] %v1792_v61  ;;  %1494 = vst [vmem:[%s2752_s6 + $0xa0] sm:$0xff] %v1808_v62  ;;  %v1793_v1 = vpack.c.bf16 %v1229_v63, %v1228_v57  ;;  %v1809_v2 = vpack.c.bf16 %v1261_v0, %v1260_v58 }
 0x1c0   : > { %1479 = vst [vmem:[%s2752_s6 + $0x28] sm:$0xff] %v1793_v1  ;;  %1495 = vst [vmem:[%s2752_s6 + $0xa8] sm:$0xff] %v1809_v2  ;;  %v882_v3 = vpop.f32.mrb[12].mxu0  ;;  %v962_v4 = vpop.f32.mrb[12].mxu1 }
 0x1c1   : > { %v1230_v7 = vadd.f32 %v2737_v5, %v882_v3  ;;  %v1262_v8 = vadd.f32 %v2737_v5, %v962_v4  ;;  %v884_v9 = vpop.f32.mrb[13].mxu0  ;;  %v964_v10 = vpop.f32.mrb[13].mxu1 }
 0x1c2   : > { %v1231_v11 = vadd.f32 %v2740_v6, %v884_v9  ;;  %v1263_v12 = vadd.f32 %v2740_v6, %v964_v10  ;;  %v886_v13 = vpop.f32.mrb[14].mxu0  ;;  %v966_v14 = vpop.f32.mrb[14].mxu1 }
 0x1c3   : > { %v1232_v15 = vadd.f32 %v2737_v5, %v886_v13  ;;  %v1264_v16 = vadd.f32 %v2737_v5, %v966_v14  ;;  %v888_v17 = vpop.f32.mrb[15].mxu0  ;;  %v968_v18 = vpop.f32.mrb[15].mxu1 }
 0x1c4   : > { %v1794_v19 = vpack.c.bf16 %v1231_v11, %v1230_v7  ;;  %v1810_v20 = vpack.c.bf16 %v1263_v12, %v1262_v8  ;;  %v1233_v21 = vadd.f32 %v2740_v6, %v888_v17  ;;  %v1265_v22 = vadd.f32 %v2740_v6, %v968_v18 }
 0x1c6   : > { %1480 = vst [vmem:[%s2752_s6 + $0x30] sm:$0xff] %v1794_v19  ;;  %1496 = vst [vmem:[%s2752_s6 + $0xb0] sm:$0xff] %v1810_v20  ;;  %v1795_v23 = vpack.c.bf16 %v1233_v21, %v1232_v15  ;;  %v1811_v24 = vpack.c.bf16 %v1265_v22, %v1264_v16 }
 0x1c8   : > { %1481 = vst [vmem:[%s2752_s6 + $0x38] sm:$0xff] %v1795_v23  ;;  %1497 = vst [vmem:[%s2752_s6 + $0xb8] sm:$0xff] %v1811_v24  ;;  %v892_v25 = vpop.f32.mrb[16].mxu0  ;;  %v972_v26 = vpop.f32.mrb[16].mxu1 }
 0x1c9   : > { %v1234_v27 = vadd.f32 %v2737_v5, %v892_v25  ;;  %v1266_v28 = vadd.f32 %v2737_v5, %v972_v26  ;;  %v894_v29 = vpop.f32.mrb[17].mxu0  ;;  %v974_v30 = vpop.f32.mrb[17].mxu1 }
 0x1ca   : > { %v1235_v31 = vadd.f32 %v2740_v6, %v894_v29  ;;  %v1267_v32 = vadd.f32 %v2740_v6, %v974_v30  ;;  %v896_v33 = vpop.f32.mrb[18].mxu0  ;;  %v976_v34 = vpop.f32.mrb[18].mxu1 }
 0x1cb   : > { %v1236_v35 = vadd.f32 %v2737_v5, %v896_v33  ;;  %v1268_v36 = vadd.f32 %v2737_v5, %v976_v34  ;;  %v898_v37 = vpop.f32.mrb[19].mxu0  ;;  %v978_v38 = vpop.f32.mrb[19].mxu1 }
 0x1cc   : > { %v1796_v39 = vpack.c.bf16 %v1235_v31, %v1234_v27  ;;  %v1812_v40 = vpack.c.bf16 %v1267_v32, %v1266_v28  ;;  %v1237_v41 = vadd.f32 %v2740_v6, %v898_v37  ;;  %v1269_v42 = vadd.f32 %v2740_v6, %v978_v38 }
 0x1ce   : > { %1482 = vst [vmem:[%s2752_s6 + $0x40] sm:$0xff] %v1796_v39  ;;  %1498 = vst [vmem:[%s2752_s6 + $0xc0] sm:$0xff] %v1812_v40  ;;  %v1797_v43 = vpack.c.bf16 %v1237_v41, %v1236_v35  ;;  %v1813_v44 = vpack.c.bf16 %v1269_v42, %v1268_v36 }
 0x1d0   : > { %1483 = vst [vmem:[%s2752_s6 + $0x48] sm:$0xff] %v1797_v43  ;;  %1499 = vst [vmem:[%s2752_s6 + $0xc8] sm:$0xff] %v1813_v44  ;;  %v902_v45 = vpop.f32.mrb[20].mxu0  ;;  %v982_v46 = vpop.f32.mrb[20].mxu1 }
 0x1d1   : > { %v1238_v47 = vadd.f32 %v2737_v5, %v902_v45  ;;  %v1270_v48 = vadd.f32 %v2737_v5, %v982_v46  ;;  %v904_v49 = vpop.f32.mrb[21].mxu0  ;;  %v984_v50 = vpop.f32.mrb[21].mxu1 }
 0x1d2   : > { %v1239_v51 = vadd.f32 %v2740_v6, %v904_v49  ;;  %v1271_v52 = vadd.f32 %v2740_v6, %v984_v50  ;;  %v906_v53 = vpop.f32.mrb[22].mxu0  ;;  %v986_v54 = vpop.f32.mrb[22].mxu1 }
 0x1d3   : > { %v1240_v55 = vadd.f32 %v2737_v5, %v906_v53  ;;  %v1272_v56 = vadd.f32 %v2737_v5, %v986_v54  ;;  %v908_v57 = vpop.f32.mrb[23].mxu0  ;;  %v988_v58 = vpop.f32.mrb[23].mxu1 }
 0x1d4   : > { %v1798_v59 = vpack.c.bf16 %v1239_v51, %v1238_v47  ;;  %v1814_v60 = vpack.c.bf16 %v1271_v52, %v1270_v48  ;;  %v1241_v61 = vadd.f32 %v2740_v6, %v908_v57  ;;  %v1273_v62 = vadd.f32 %v2740_v6, %v988_v58 }
 0x1d6   : > { %1484 = vst [vmem:[%s2752_s6 + $0x50] sm:$0xff] %v1798_v59  ;;  %1500 = vst [vmem:[%s2752_s6 + $0xd0] sm:$0xff] %v1814_v60  ;;  %v1799_v63 = vpack.c.bf16 %v1241_v61, %v1240_v55  ;;  %v1815_v0 = vpack.c.bf16 %v1273_v62, %v1272_v56 }
 0x1d8   : > { %1485 = vst [vmem:[%s2752_s6 + $0x58] sm:$0xff] %v1799_v63  ;;  %1501 = vst [vmem:[%s2752_s6 + $0xd8] sm:$0xff] %v1815_v0  ;;  %v912_v1 = vpop.f32.mrb[24].mxu0  ;;  %v992_v2 = vpop.f32.mrb[24].mxu1 }
 0x1d9   : > { %v1242_v3 = vadd.f32 %v2737_v5, %v912_v1  ;;  %v1274_v4 = vadd.f32 %v2737_v5, %v992_v2  ;;  %v914_v7 = vpop.f32.mrb[25].mxu0  ;;  %v994_v8 = vpop.f32.mrb[25].mxu1 }
 0x1da   : > { %v1243_v9 = vadd.f32 %v2740_v6, %v914_v7  ;;  %v1275_v10 = vadd.f32 %v2740_v6, %v994_v8  ;;  %v916_v11 = vpop.f32.mrb[26].mxu0  ;;  %v996_v12 = vpop.f32.mrb[26].mxu1 }
 0x1db   : > { %v1244_v13 = vadd.f32 %v2737_v5, %v916_v11  ;;  %v1276_v14 = vadd.f32 %v2737_v5, %v996_v12  ;;  %v918_v15 = vpop.f32.mrb[27].mxu0  ;;  %v998_v16 = vpop.f32.mrb[27].mxu1 }
 0x1dc   : > { %v1800_v17 = vpack.c.bf16 %v1243_v9, %v1242_v3  ;;  %v1816_v18 = vpack.c.bf16 %v1275_v10, %v1274_v4  ;;  %v1245_v19 = vadd.f32 %v2740_v6, %v918_v15  ;;  %v1277_v20 = vadd.f32 %v2740_v6, %v998_v16 }
 0x1de   : > { %1486 = vst [vmem:[%s2752_s6 + $0x60] sm:$0xff] %v1800_v17  ;;  %1502 = vst [vmem:[%s2752_s6 + $0xe0] sm:$0xff] %v1816_v18  ;;  %v1801_v21 = vpack.c.bf16 %v1245_v19, %v1244_v13  ;;  %v1817_v22 = vpack.c.bf16 %v1277_v20, %v1276_v14 }
 0x1e0   : > { %1487 = vst [vmem:[%s2752_s6 + $0x68] sm:$0xff] %v1801_v21  ;;  %1503 = vst [vmem:[%s2752_s6 + $0xe8] sm:$0xff] %v1817_v22  ;;  %v922_v23 = vpop.f32.mrb[28].mxu0  ;;  %v1002_v24 = vpop.f32.mrb[28].mxu1 }
 0x1e1   : > { %v1246_v25 = vadd.f32 %v2737_v5, %v922_v23  ;;  %v1278_v26 = vadd.f32 %v2737_v5, %v1002_v24  ;;  %v924_v27 = vpop.f32.mrb[29].mxu0  ;;  %v1004_v28 = vpop.f32.mrb[29].mxu1 }
 0x1e2   : > { %v1247_v29 = vadd.f32 %v2740_v6, %v924_v27  ;;  %v1279_v30 = vadd.f32 %v2740_v6, %v1004_v28  ;;  %v926_v31 = vpop.f32.mrb[30].mxu0  ;;  %v1006_v32 = vpop.f32.mrb[30].mxu1 }
 0x1e3   : > { %v1248_v33 = vadd.f32 %v2737_v5, %v926_v31  ;;  %v1280_v34 = vadd.f32 %v2737_v5, %v1006_v32  ;;  %v928_v35 = vpop.f32.mrb[31].mxu0  ;;  %v1008_v36 = vpop.f32.mrb[31].mxu1 }
 0x1e4   : > { %v1802_v37 = vpack.c.bf16 %v1247_v29, %v1246_v25  ;;  %v1818_v38 = vpack.c.bf16 %v1279_v30, %v1278_v26  ;;  %v1249_v39 = vadd.f32 %v2740_v6, %v928_v35  ;;  %v1281_v40 = vadd.f32 %v2740_v6, %v1008_v36 }
 0x1e6   : > { %1488 = vst [vmem:[%s2752_s6 + $0x70] sm:$0xff] %v1802_v37  ;;  %1504 = vst [vmem:[%s2752_s6 + $0xf0] sm:$0xff] %v1818_v38  ;;  %v1803_v5 = vpack.c.bf16 %v1249_v39, %v1248_v33  ;;  %v1819_v41 = vpack.c.bf16 %v1281_v40, %v1280_v34 }
 0x1e8   : > { %1489 = vst [vmem:[%s2752_s6 + $0x78] sm:$0xff] %v1803_v5  ;;  %1505 = vst [vmem:[%s2752_s6 + $0xf8] sm:$0xff] %v1819_v41 }
 0x1e9   : > { %2194 = shalt.err (!%p2191_p1)
}
 0x1ea   : > { %s2195_s7 = scalar_lea.hbm %s2844_s15, 4096  ;;  %s2199_s10 = scalar_lea.hbm %s2991_s26, 36864 }
 0x1eb   : > { %p2196_p0 = scmp.ne.s32.totalorder %s2844_s15, %s2195_s7  ;;  %p2200_p8 = scmp.lt.u32.totalorder %s2844_s15, %s2991_s26 }
 0x1ec   : > { %p2201_p10 = scmp.lt.u32.totalorder %s2199_s10, %s2195_s7  ;;  %p2203_p7 = scmp.lt.u32.totalorder %s2195_s7, %s2844_s15 }
 0x1ed   : > { %p2197_p12 = pnand %p2196_p0, %p2992_p11 }
 0x1ee   : > { %p2202_p6 = por %p2201_p10, %p2200_p8 }
 0x1ef   : > { %p2198_p13 = pneg %p2197_p12 }
 0x1f0   : > { %p2204_p5 = por %p2203_p7, %p2202_p6 }
 0x1f2   : > { %p2205_p2 = pnand %p2204_p5, %p2198_p13 }
 0x1f4   : > { %2208 = shalt.err (!%p2205_p2)
}
 0x1f5   : > { %s2340_s1 = smov 128   ;;  %s2341_s17 = smov 384  }
 0x1f6   : > { %s2342_s22 = smov 8  }
 0x1f7   : > { %1859 = dma.vmem_to_hbm [thread:$0]  (%p2992_p11), %s2846_s21, 4096, %s2844_s15, %s2854_s30, %s2340_s1, %s2341_s17, %s2342_s22  }
 0x1f8 PF: > { %p1876_p3 = scmp.ge.s32.totalorder %s2331_s25, 2  ;;  %s1538_s3 = sand.u32 1, %s2279_s12  }
 0x1f9   : > { %p2993_p9 = scmp.ne.s32.totalorder %s2977_s8, 0  ;;  %s1539_s20 = scalar_lea.sflag [#allocation5], %s1538_s3 }
 0x1fb   : > { %p1872_p4 = pnand %p1876_p3, %p2993_p9 }
 0x1fd   : > { %2274 = dma.done.wait (!%p1872_p4), %s1539_s20, 4096  }
 0x1fe   : > { %2276 = vsyncadd (!%p1872_p4), %s1539_s20, 4294963200  ;;  %s22_s25 = sadd.s32 1, %s2331_s25   ;;  %s2995_s28 = sld [smem:[#allocation13_spill]] }
 0x1ff   : > { %p2883_p1 = scmp.ge.s32.totalorder %s22_s25, 11   ;;  %s2996_s14 = sld [smem:[#allocation24_spill]] }
 0x200   : > { %s2997_s21 = sld [smem:[#allocation14_spill]]  ;;  %s2998_s17 = sld [smem:[#allocation22_spill]] }
 0x201   : > { %s2999_s23 = sld [smem:[#allocation15_spill]]  ;;  %s3000_s20 = sld [smem:[#allocation23_spill]] }
 0x202   : > { %s3001_s8 = sld [smem:[#allocation18_spill]]  ;;  %s3002_s22 = sld [smem:[#allocation19_spill]] }
 0x203   : > { %s3003_s30 = sld [smem:[#allocation20_spill]]  ;;  %s3004_s24 = sld [smem:[#allocation21_spill]] }
 0x204   : > { %s3005_s12 = smov %s2283_s13  ;;  %s3006_s13 = smov %s2995_s28 }
 0x205   : > { %s3007_s15 = smov %s2295_s16  ;;  %s3009_s18 = smov %s2307_s19 }
 0x206   : > { %s3008_s16 = smov %s2997_s21  ;;  %21 = sbr.rel (!%p2883_p1) target bundleno = 15 (0xf), region = 109 }
 0x207   : > { %s3010_s19 = smov %s2999_s23 }
 0x208   : > { %s3011_s21 = smov %s3001_s8 }
 0x209   : > { %s3012_s23 = smov %s3003_s30 }
 0x20d   :  { %1544 = vsyncpa [#allocation4], 1 }
 0x20e   :  { %1546 = vsyncpa [#allocation4 + $0x1], 1 }
 0x20f   :  { %1547 = vsyncpa [#allocation7], 1 }
 0x210   :  { %1549 = vsyncpa [#allocation7 + $0x1], 1 }
 0x211   :  { %1550 = vsyncpa [#allocation5], 1 }
 0x212   :  { %1552 = vsyncpa [#allocation5 + $0x1], 1 }

</bundles_post_ra>
